<compile_context>
chip_gen: v7x
topology: tpu7x:2x2x1
jax: 0.10.0
libtpu: 0.0.40
codegen_flags: <defaults>
</compile_context>

<pallas_src>
import math
from functools import partial

import jax
import jax.numpy as jnp
from jax import lax
from jax.experimental import pallas as pl
from jax.experimental.pallas import tpu as pltpu

DROPOUT_P = 0.1
BASE_SEED = 1234
_KEEP_BITS = 23
_DROP_THRESH = int(DROPOUT_P * (1 << _KEEP_BITS))  # drop if hashed bits < thresh


def _hash_u32(x):
    # lowbias32-style integer mixer; portable (plain VPU xor/mul/shift ops).
    x = x ^ (x >> jnp.uint32(16))
    x = x * jnp.uint32(0x7FEB352D)
    x = x ^ (x >> jnp.uint32(15))
    x = x * jnp.uint32(0x846CA68B)
    x = x ^ (x >> jnp.uint32(16))
    return x


def _attn_kernel(q_ref, k_ref, v_ref, mask_ref, o_ref, *, tq, s_len):
    bh = pl.program_id(0)
    qi = pl.program_id(1)
    nq = pl.num_programs(1)

    d = q_ref.shape[-1]
    scale = 1.0 / math.sqrt(d)

    q = q_ref[0]            # (TQ, D) f32
    k = k_ref[0]            # (S,  D) f32
    v = v_ref[0]            # (S,  D) f32
    m = mask_ref[...]       # (TQ, S) f32

    # Fold the 1/sqrt(D) scale into q (S*D elements, not S*S), cast operands to
    # bf16 for MXU throughput, accumulate in f32.
    qb = (q * scale).astype(jnp.bfloat16)
    kb = k.astype(jnp.bfloat16)

    # QK^T: contract the last dim of both operands -> no materialized k.T.
    s = lax.dot_general(qb, kb, (((1,), (1,)), ((), ())),
                        preferred_element_type=jnp.float32)       # (TQ, S)
    s = s + m

    # Numerically stable softmax; fold dropout scale 1/(1-p) into the per-row
    # reciprocal so dropout costs one select + one multiply over (TQ, S).
    s_max = jnp.max(s, axis=-1, keepdims=True)
    p = jnp.exp(s - s_max)
    denom = jnp.sum(p, axis=-1, keepdims=True)
    inv = (1.0 / (1.0 - DROPOUT_P)) / denom                        # (TQ, 1)

    # Dropout keep mask from a stateless counter hash: counter is unique per
    # logical (batch*head, query_row, key_col) element => deterministic.
    row = lax.broadcasted_iota(jnp.int32, p.shape, 0)
    col = lax.broadcasted_iota(jnp.int32, p.shape, 1)
    block_id = bh * nq + qi
    ctr = BASE_SEED + block_id * (tq * s_len) + row * s_len + col  # int32, no overflow
    bits = _hash_u32(ctr.astype(jnp.uint32))
    keep = (bits >> jnp.uint32(32 - _KEEP_BITS)) >= jnp.uint32(_DROP_THRESH)

    attn = jnp.where(keep, p * inv, 0.0)

    out = jnp.dot(attn.astype(jnp.bfloat16), v.astype(jnp.bfloat16),
                  preferred_element_type=jnp.float32)              # (TQ, D)
    o_ref[0] = out.astype(o_ref.dtype)


def attention(query, key, value, attn_mask, *, q_tile=None):
    B, H, S, D = query.shape
    assert attn_mask.shape[-2:] == (S, S)

    tq = q_tile if q_tile is not None else min(256, S)
    assert S % tq == 0 and tq % 8 == 0 and S % 128 == 0
    nq = S // tq

    # Collapse (B, H) -> one grid axis (leading-dim reshape is free).
    q2 = query.reshape(B * H, S, D)
    k2 = key.reshape(B * H, S, D)
    v2 = value.reshape(B * H, S, D)
    m2 = attn_mask.reshape(S, S)

    head_spec = pl.BlockSpec((1, tq, D), lambda bh, qi: (bh, qi, 0))
    kv_spec = pl.BlockSpec((1, S, D), lambda bh, qi: (bh, 0, 0))
    mask_spec = pl.BlockSpec((tq, S), lambda bh, qi: (qi, 0))

    out = pl.pallas_call(
        partial(_attn_kernel, tq=tq, s_len=S),
        out_shape=jax.ShapeDtypeStruct((B * H, S, D), jnp.float32),
        grid_spec=pltpu.PrefetchScalarGridSpec(
            num_scalar_prefetch=0,
            grid=(B * H, nq),
            in_specs=[head_spec, kv_spec, kv_spec, mask_spec],
            out_specs=head_spec,
        ),
        compiler_params=pltpu.CompilerParams(
            dimension_semantics=("parallel", "parallel"),
        ),
    )(q2, k2, v2, m2)

    return out.reshape(B, H, S, D)


if __name__ == "__main__":
    # Small shapes consistent with the module's structure (B=1, 8 heads, D=64).
    B, H, S, D = 1, 8, 128, 64

    k0, k1, k2, k3 = jax.random.split(jax.random.PRNGKey(0), 4)
    query = jax.random.normal(k0, (B, H, S, D), dtype=jnp.float32)
    key = jax.random.normal(k1, (B, H, S, D), dtype=jnp.float32)
    value = jax.random.normal(k2, (B, H, S, D), dtype=jnp.float32)
    attn_mask = jax.random.normal(k3, (1, 1, S, S), dtype=jnp.float32)

    out = attention(query, key, value, attn_mask)
    out = jax.block_until_ready(out)

    assert out.shape == (B, H, S, D)
    assert bool(jnp.all(jnp.isfinite(out)))
    print("KERNEL_OK")
</pallas_src>

<mosaic_0001>
module attributes {stable_mosaic.version = 11 : i64} {
  func.func @_attn_kernel(%arg0: i32, %arg1: i32, %arg2: memref<1x128x64xf32, #tpu.memory_space<vmem>>, %arg3: memref<1x128x64xf32, #tpu.memory_space<vmem>>, %arg4: memref<1x128x64xf32, #tpu.memory_space<vmem>>, %arg5: memref<128x128xf32, #tpu.memory_space<vmem>>, %arg6: memref<1x128x64xf32, #tpu.memory_space<vmem>>) attributes {dimension_semantics = [#tpu.dimension_semantics<parallel>, #tpu.dimension_semantics<parallel>], iteration_bounds = array<i64: 8, 1>, scalar_prefetch = 0 : i64, scratch_operands = 0 : i64, tpu.core_type = #tpu.core_type<tc>, window_params = [{transform_indices = @transform_0, window_bounds = array<i64: 1, 128, 64>}, {transform_indices = @transform_1, window_bounds = array<i64: 1, 128, 64>}, {transform_indices = @transform_2, window_bounds = array<i64: 1, 128, 64>}, {transform_indices = @transform_3, window_bounds = array<i64: 128, 128>}, {transform_indices = @transform_4, window_bounds = array<i64: 1, 128, 64>}]} {
    %c0 = arith.constant 0 : index
    %c0_0 = arith.constant 0 : index
    %c0_1 = arith.constant 0 : index
    %0 = vector.load %arg2[%c0, %c0_0, %c0_1] : memref<1x128x64xf32, #tpu.memory_space<vmem>>, vector<1x128x64xf32>
    %1 = vector.shape_cast %0 : vector<1x128x64xf32> to vector<128x64xf32>
    %c0_2 = arith.constant 0 : index
    %c0_3 = arith.constant 0 : index
    %c0_4 = arith.constant 0 : index
    %2 = vector.load %arg3[%c0_2, %c0_3, %c0_4] : memref<1x128x64xf32, #tpu.memory_space<vmem>>, vector<1x128x64xf32>
    %3 = vector.shape_cast %2 : vector<1x128x64xf32> to vector<128x64xf32>
    %c0_5 = arith.constant 0 : index
    %c0_6 = arith.constant 0 : index
    %c0_7 = arith.constant 0 : index
    %4 = vector.load %arg4[%c0_5, %c0_6, %c0_7] : memref<1x128x64xf32, #tpu.memory_space<vmem>>, vector<1x128x64xf32>
    %5 = vector.shape_cast %4 : vector<1x128x64xf32> to vector<128x64xf32>
    %c0_8 = arith.constant 0 : index
    %c0_9 = arith.constant 0 : index
    %6 = vector.load %arg5[%c0_8, %c0_9] : memref<128x128xf32, #tpu.memory_space<vmem>>, vector<128x128xf32>
    %cst = arith.constant 1.250000e-01 : f32
    %7 = vector.broadcast %cst : f32 to vector<128x64xf32>
    %8 = arith.mulf %1, %7 : vector<128x64xf32>
    %9 = arith.truncf %8 : vector<128x64xf32> to vector<128x64xbf16>
    %10 = arith.truncf %3 : vector<128x64xf32> to vector<128x64xbf16>
    %cst_10 = arith.constant dense<0.000000e+00> : vector<128x128xf32>
    %11 = tpu.matmul %9, %10, %cst_10 {dimension_numbers = #tpu.dot_dimension_numbers<[1], [1], [0], [0], [0, 0, 1, 0], [], []>} : vector<128x64xbf16>, vector<128x64xbf16>, vector<128x128xf32> -> vector<128x128xf32>
    %12 = arith.addf %11, %6 : vector<128x128xf32>
    %cst_11 = arith.constant dense<0xFF800000> : vector<128xf32>
    %13 = vector.multi_reduction <maximumf>, %12, %cst_11 [1] : vector<128x128xf32> to vector<128xf32>
    %14 = vector.shape_cast %13 : vector<128xf32> to vector<128x1xf32>
    %15 = vector.broadcast %14 : vector<128x1xf32> to vector<128x128xf32>
    %16 = arith.subf %12, %15 : vector<128x128xf32>
    %17 = math.exp %16 : vector<128x128xf32>
    %cst_12 = arith.constant dense<0.000000e+00> : vector<128xf32>
    %18 = vector.multi_reduction <add>, %17, %cst_12 [1] : vector<128x128xf32> to vector<128xf32>
    %19 = vector.shape_cast %18 : vector<128xf32> to vector<128x1xf32>
    %cst_13 = arith.constant 1.11111116 : f32
    %20 = vector.broadcast %cst_13 : f32 to vector<128x1xf32>
    %21 = arith.divf %20, %19 : vector<128x1xf32>
    %22 = tpu.iota {dimensions = array<i32: 0>} : vector<128x128xi32>
    %23 = tpu.iota {dimensions = array<i32: 1>} : vector<128x128xi32>
    %c1_i32 = arith.constant 1 : i32
    %24 = arith.muli %arg0, %c1_i32 : i32
    %25 = arith.addi %24, %arg1 : i32
    %c16384_i32 = arith.constant 16384 : i32
    %26 = arith.muli %25, %c16384_i32 : i32
    %c1234_i32 = arith.constant 1234 : i32
    %27 = arith.addi %c1234_i32, %26 : i32
    %c128_i32 = arith.constant 128 : i32
    %28 = vector.broadcast %c128_i32 : i32 to vector<128x128xi32>
    %29 = arith.muli %22, %28 : vector<128x128xi32>
    %30 = vector.broadcast %27 : i32 to vector<128x128xi32>
    %31 = arith.addi %30, %29 : vector<128x128xi32>
    %32 = arith.addi %31, %23 : vector<128x128xi32>
    %c16_i32 = arith.constant 16 : i32
    %33 = vector.broadcast %c16_i32 : i32 to vector<128x128xi32>
    %34 = arith.shrui %32, %33 : vector<128x128xi32>
    %35 = arith.xori %32, %34 : vector<128x128xi32>
    %c2146121005_i32 = arith.constant 2146121005 : i32
    %36 = vector.broadcast %c2146121005_i32 : i32 to vector<128x128xi32>
    %37 = arith.muli %35, %36 : vector<128x128xi32>
    %c15_i32 = arith.constant 15 : i32
    %38 = vector.broadcast %c15_i32 : i32 to vector<128x128xi32>
    %39 = arith.shrui %37, %38 : vector<128x128xi32>
    %40 = arith.xori %37, %39 : vector<128x128xi32>
    %c-2073254261_i32 = arith.constant -2073254261 : i32
    %41 = vector.broadcast %c-2073254261_i32 : i32 to vector<128x128xi32>
    %42 = arith.muli %40, %41 : vector<128x128xi32>
    %c16_i32_14 = arith.constant 16 : i32
    %43 = vector.broadcast %c16_i32_14 : i32 to vector<128x128xi32>
    %44 = arith.shrui %42, %43 : vector<128x128xi32>
    %45 = arith.xori %42, %44 : vector<128x128xi32>
    %c9_i32 = arith.constant 9 : i32
    %46 = vector.broadcast %c9_i32 : i32 to vector<128x128xi32>
    %47 = arith.shrui %45, %46 : vector<128x128xi32>
    %c838860_i32 = arith.constant 838860 : i32
    %48 = vector.broadcast %c838860_i32 : i32 to vector<128x128xi32>
    %49 = arith.cmpi uge, %47, %48 : vector<128x128xi32>
    %50 = vector.broadcast %21 : vector<128x1xf32> to vector<128x128xf32>
    %51 = arith.mulf %17, %50 : vector<128x128xf32>
    %cst_15 = arith.constant 0.000000e+00 : f32
    %52 = vector.broadcast %cst_15 : f32 to vector<128x128xf32>
    %53 = arith.select %49, %51, %52 : vector<128x128xi1>, vector<128x128xf32>
    %54 = arith.truncf %53 : vector<128x128xf32> to vector<128x128xbf16>
    %55 = arith.truncf %5 : vector<128x64xf32> to vector<128x64xbf16>
    %cst_16 = arith.constant dense<0.000000e+00> : vector<128x64xf32>
    %56 = tpu.matmul %54, %55, %cst_16 {dimension_numbers = #tpu.dot_dimension_numbers<[1], [0], [0], [1], [0, 0, 1, 1], [], []>} : vector<128x128xbf16>, vector<128x64xbf16>, vector<128x64xf32> -> vector<128x64xf32>
    %c0_17 = arith.constant 0 : index
    %c0_18 = arith.constant 0 : index
    %c0_19 = arith.constant 0 : index
    %57 = vector.load %arg6[%c0_17, %c0_18, %c0_19] : memref<1x128x64xf32, #tpu.memory_space<vmem>>, vector<1x128x64xf32>
    %58 = vector.shape_cast %57 : vector<1x128x64xf32> to vector<128x64xf32>
    %59 = vector.shape_cast %56 : vector<128x64xf32> to vector<1x128x64xf32>
    tpu.vector_store %arg6[%c0_17, %c0_18, %c0_19], %59 {strides = array<i32>} : memref<1x128x64xf32, #tpu.memory_space<vmem>>, vector<1x128x64xf32>,
    return
  }
  func.func @transform_0(%arg0: i32, %arg1: i32) -> (i32, i32, i32) {
    %c0_i32 = arith.constant 0 : i32
    %c0_i32_0 = arith.constant 0 : i32
    return %arg0, %arg1, %c0_i32 : i32, i32, i32
  }
  func.func @transform_1(%arg0: i32, %arg1: i32) -> (i32, i32, i32) {
    %c0_i32 = arith.constant 0 : i32
    %c0_i32_0 = arith.constant 0 : i32
    %c0_i32_1 = arith.constant 0 : i32
    return %arg0, %c0_i32, %c0_i32_0 : i32, i32, i32
  }
  func.func @transform_2(%arg0: i32, %arg1: i32) -> (i32, i32, i32) {
    %c0_i32 = arith.constant 0 : i32
    %c0_i32_0 = arith.constant 0 : i32
    %c0_i32_1 = arith.constant 0 : i32
    return %arg0, %c0_i32, %c0_i32_0 : i32, i32, i32
  }
  func.func @transform_3(%arg0: i32, %arg1: i32) -> (i32, i32) {
    %c0_i32 = arith.constant 0 : i32
    %c0_i32_0 = arith.constant 0 : i32
    return %arg1, %c0_i32 : i32, i32
  }
  func.func @transform_4(%arg0: i32, %arg1: i32) -> (i32, i32, i32) {
    %c0_i32 = arith.constant 0 : i32
    %c0_i32_0 = arith.constant 0 : i32
    return %arg0, %arg1, %c0_i32 : i32, i32, i32
  }
}

</mosaic_0001>

<bundles_post_ra>
// kernel: tpu_custom_call.1
= control target key start
LH: loop header
LB: loop body
LE: loop exit
PB: predicated region body
PF: predicated region fallthrough
CT: control target
= control target key end

     0   :  { %s1498_s15 = smov 0   ;;  %s1500_s16 = smov 0   ;;  %s2022_s0 = inlined_call_operand.vmem [shape: f32[8,128,64], index: 0, kind: input, shape index: {}]   ;;  %s2023_s1 = inlined_call_operand.vmem [shape: f32[8,128,64], index: 1, kind: input, shape index: {}]   ;;  %s2024_s2 = inlined_call_operand.vmem [shape: f32[8,128,64], index: 2, kind: input, shape index: {}]   ;;  %s2025_s3 = inlined_call_operand.vmem [shape: f32[128,128], index: 3, kind: input, shape index: {}]   ;;  %s2026_s4 = inlined_call_operand.vmem [shape: f32[8,128,64], index: 4, kind: output, shape index: {}]  }
   0x1   :  { %s1502_s17 = smov 0  }
   0x2 LB: > { %s26_s18 = sadd.s32 1, %s1467_s16  ;;  %p1209_p0 = scmp.ge.s32.totalorder %s1471_s17, 1  ;;  %s1471_s17 = sphi %s1502_s17, %s14_s17   ;;  %s1467_s16 = sphi %s1500_s16, %s2056_s16   ;;  %s1463_s15 = sphi %s1498_s15, %s2055_s15  }
   0x3   : > { %p28_p1 = scmp.ge.s32.totalorder %s26_s18, 8  ;;  %p214_p2 = scmp.lt.s32.totalorder %s1471_s17, 9 }
   0x5   : > { %s2058_s18 = smov (%p28_p1, %s26_s18), 0  ;;  %p215_p3 = pnand %p1209_p0, %p214_p2 }
   0x6   : > { %p264_p4 = scmp.lt.s32.totalorder (!%p215_p3), %s1463_s15, 7  ;;  %vm396_vm0 = vcmask (!%p215_p3), 523264  }
   0x7   : > { %218 = sbr.rel (%p215_p3) target bundleno = 864 (0x360), region = 36 }
   0xe   : > { %s265_s19 = scalar_select %p264_p4, %s1463_s15, 7 }
  0x10   : > { %s1520_s20 = sshll.u32 %s265_s19, 7  ;;  %s1226_s19 = sshll.u32 %s1463_s15, 14 }
  0x11   : > { %s1526_s23 = scalar_lea.vmem %s2023_s1, %s1520_s20  ;;  %s1536_s26 = scalar_lea.vmem %s2022_s0, %s1520_s20 }
  0x12   : > { %v316_v0 = vld [vmem:[%s1526_s23] sm:$0xff]  ;;  %v317_v1 = vld [vmem:[%s1526_s23 + $0x8] sm:$0xff]  ;;  %v318_v2 = vld [vmem:[%s1526_s23 + $0x10] sm:$0xff]  ;;  %s1690_s14 = scalar_lea.vmem %s2024_s2, %s1520_s20  ;;  %s707_s21 = sadd.s32 1234, %s1226_s19 }
  0x13   : > { %v388_v3 = vpack.c.bf16 %v317_v1, %v316_v0  ;;  %v319_v4 = vld [vmem:[%s1526_s23 + $0x18] sm:$0xff]  ;;  %v300_v7 = vld [vmem:[%s1536_s26] sm:$0xff]  ;;  %v301_v8 = vld [vmem:[%s1536_s26 + $0x8] sm:$0xff] }
  0x14   : > { %v389_v5 = vpack.c.bf16 %v319_v4, %v318_v2  ;;  %v320_v9 = vld [vmem:[%s1526_s23 + $0x20] sm:$0xff]  ;;  %v321_v10 = vld [vmem:[%s1526_s23 + $0x28] sm:$0xff]  ;;  %v364_v11 = vmul.f32 0.125, %v300_v7  ;;  %v365_v12 = vmul.f32 0.125, %v301_v8  ;;  %v322_v16 = vld [vmem:[%s1526_s23 + $0x30] sm:$0xff] }
  0x15   : > { %1353 = vmatprep.subr.msk.bf16.mxu0 %vm396_vm0, %v388_v3  ;;  %v422_v6 = vsel %vm396_vm0, %v388_v3, 0  ;;  %v390_v14 = vpack.c.bf16 %v321_v10, %v320_v9  ;;  %v323_v17 = vld [vmem:[%s1526_s23 + $0x38] sm:$0xff]  ;;  %v324_v20 = vld [vmem:[%s1526_s23 + $0x40] sm:$0xff]  ;;  %v325_v21 = vld [vmem:[%s1526_s23 + $0x48] sm:$0xff] }
  0x16   : > { %1290 = vmatpush3.bf16.xpose.msra.mxu0 %v422_v6  ;;  %v425_v13 = vsel %vm396_vm0, %v389_v5, 0  ;;  %v380_v15 = vpack.c.bf16 %v365_v12, %v364_v11  ;;  %v391_v19 = vpack.c.bf16 %v323_v17, %v322_v16  ;;  %v392_v23 = vpack.c.bf16 %v325_v21, %v324_v20  ;;  %v326_v24 = vld [vmem:[%s1526_s23 + $0x50] sm:$0xff]  ;;  %v327_v25 = vld [vmem:[%s1526_s23 + $0x58] sm:$0xff]  ;;  %v328_v28 = vld [vmem:[%s1526_s23 + $0x60] sm:$0xff] }
  0x17   : > { %1354 = vmatprep.subr.msk.bf16.mxu0 %vm396_vm0, %v389_v5  ;;  %v428_v18 = vsel %vm396_vm0, %v390_v14, 0  ;;  %v393_v27 = vpack.c.bf16 %v327_v25, %v326_v24  ;;  %v329_v29 = vld [vmem:[%s1526_s23 + $0x68] sm:$0xff]  ;;  %v330_v32 = vld [vmem:[%s1526_s23 + $0x70] sm:$0xff]  ;;  %v331_v33 = vld [vmem:[%s1526_s23 + $0x78] sm:$0xff]  ;;  %s1979_s23 = scalar_lea.vmem %s2026_s4, %s1520_s20 }
  0x18   : > { %1305 = vmatprep.mubr.msk.bf16.mxu0 %vm396_vm0, %v380_v15  ;;  %v431_v22 = vsel %vm396_vm0, %v391_v19, 0  ;;  %v434_v26 = vsel %vm396_vm0, %v392_v23, 0  ;;  %v394_v31 = vpack.c.bf16 %v329_v29, %v328_v28  ;;  %v395_v35 = vpack.c.bf16 %v331_v33, %v330_v32  ;;  %v302_v36 = vld [vmem:[%s1536_s26 + $0x10] sm:$0xff]  ;;  %v303_v37 = vld [vmem:[%s1536_s26 + $0x18] sm:$0xff]  ;;  %v304_v39 = vld [vmem:[%s1536_s26 + $0x20] sm:$0xff] }
  0x19   : > { %v437_v30 = vsel %vm396_vm0, %v393_v27, 0  ;;  %v305_v40 = vld [vmem:[%s1536_s26 + $0x28] sm:$0xff]  ;;  %v366_v41 = vmul.f32 0.125, %v302_v36  ;;  %v367_v42 = vmul.f32 0.125, %v303_v37  ;;  %v368_v43 = vmul.f32 0.125, %v304_v39  ;;  %v306_v47 = vld [vmem:[%s1536_s26 + $0x30] sm:$0xff] }
  0x1a   : > { %v440_v34 = vsel %vm396_vm0, %v394_v31, 0  ;;  %v443_v38 = vsel %vm396_vm0, %v395_v35, 0  ;;  %v369_v44 = vmul.f32 0.125, %v305_v40  ;;  %v307_v48 = vld [vmem:[%s1536_s26 + $0x38] sm:$0xff]  ;;  %v308_v49 = vld [vmem:[%s1536_s26 + $0x40] sm:$0xff]  ;;  %v309_v50 = vld [vmem:[%s1536_s26 + $0x48] sm:$0xff] }
  0x1b   : > { %v381_v45 = vpack.c.bf16 %v367_v42, %v366_v41  ;;  %v370_v51 = vmul.f32 0.125, %v306_v47  ;;  %v371_v52 = vmul.f32 0.125, %v307_v48  ;;  %v372_v53 = vmul.f32 0.125, %v308_v49  ;;  %v310_v57 = vld [vmem:[%s1536_s26 + $0x50] sm:$0xff]  ;;  %v311_v58 = vld [vmem:[%s1536_s26 + $0x58] sm:$0xff]  ;;  %v312_v59 = vld [vmem:[%s1536_s26 + $0x60] sm:$0xff] }
  0x1c   : > { %v382_v46 = vpack.c.bf16 %v369_v44, %v368_v43  ;;  %v373_v54 = vmul.f32 0.125, %v309_v50  ;;  %v313_v60 = vld [vmem:[%s1536_s26 + $0x68] sm:$0xff]  ;;  %v374_v61 = vmul.f32 0.125, %v310_v57  ;;  %v375_v62 = vmul.f32 0.125, %v311_v58  ;;  %v314_v3 = vld [vmem:[%s1536_s26 + $0x70] sm:$0xff]  ;;  %v315_v4 = vld [vmem:[%s1536_s26 + $0x78] sm:$0xff] }
  0x1d   : > { %v383_v55 = vpack.c.bf16 %v371_v52, %v370_v51  ;;  %v376_v63 = vmul.f32 0.125, %v312_v59  ;;  %v377_v0 = vmul.f32 0.125, %v313_v60  ;;  %v378_v5 = vmul.f32 0.125, %v314_v3  ;;  %v350_v8 = vld [vmem:[%s2025_s3 + $0x10] sm:$0xff]  ;;  %v348_v9 = vld [vmem:[%s2025_s3] sm:$0xff]  ;;  %v349_v17 = vld [vmem:[%s2025_s3 + $0x8] sm:$0xff] }
  0x1e   : > { %1292 = vmatpush3.bf16.xpose.msra.mxu0 %v425_v13  ;;  %v384_v56 = vpack.c.bf16 %v373_v54, %v372_v53  ;;  %v385_v1 = vpack.c.bf16 %v375_v62, %v374_v61  ;;  %v379_v6 = vmul.f32 0.125, %v315_v4  ;;  %v352_v20 = vld [vmem:[%s2025_s3 + $0x20] sm:$0xff]  ;;  %v355_v29 = vld [vmem:[%s2025_s3 + $0x38] sm:$0xff]  ;;  %v361_v47 = vld [vmem:[%s2025_s3 + $0x68] sm:$0xff] }
  0x1f   : > { %1355 = vmatprep.subr.msk.bf16.mxu0 %vm396_vm0, %v390_v14  ;;  %v386_v2 = vpack.c.bf16 %v377_v0, %v376_v63  ;;  %v351_v14 = vld [vmem:[%s2025_s3 + $0x18] sm:$0xff]  ;;  %v360_v43 = vld [vmem:[%s2025_s3 + $0x60] sm:$0xff]  ;;  %v362_v50 = vld [vmem:[%s2025_s3 + $0x70] sm:$0xff] }
  0x20   : > { %v387_v7 = vpack.c.bf16 %v379_v6, %v378_v5  ;;  %v359_v41 = vld [vmem:[%s2025_s3 + $0x58] sm:$0xff]  ;;  %v333_v57 = vld [vmem:[%s1690_s14 + $0x8] sm:$0xff]  ;;  %v334_v58 = vld [vmem:[%s1690_s14 + $0x10] sm:$0xff] }
  0x21   : > { %v363_v53 = vld [vmem:[%s2025_s3 + $0x78] sm:$0xff] }
  0x22   : > { %v335_v60 = vld [vmem:[%s1690_s14 + $0x18] sm:$0xff] }
  0x23   : > { %v958_v61 = vpack.c.bf16 %v335_v60, %v334_v58  ;;  %v339_v60 = vld [vmem:[%s1690_s14 + $0x38] sm:$0xff] }
  0x26   : > { %1294 = vmatpush3.bf16.xpose.msra.mxu0 %v428_v18 }
  0x27   : > { %1356 = vmatprep.subr.msk.bf16.mxu0 %vm396_vm0, %v391_v19 }
  0x2e   : > { %1296 = vmatpush3.bf16.xpose.msra.mxu0 %v431_v22 }
  0x2f   : > { %1357 = vmatprep.subr.msk.bf16.mxu0 %vm396_vm0, %v392_v23  ;;  %v353_v23 = vld [vmem:[%s2025_s3 + $0x28] sm:$0xff] }
  0x36   : > { %1298 = vmatpush3.bf16.xpose.msra.mxu0 %v434_v26  ;;  %v354_v26 = vld [vmem:[%s2025_s3 + $0x30] sm:$0xff] }
  0x37   : > { %1358 = vmatprep.subr.msk.bf16.mxu0 %vm396_vm0, %v393_v27 }
  0x3e   : > { %1300 = vmatpush3.bf16.xpose.msra.mxu0 %v437_v30 }
  0x3f   : > { %1359 = vmatprep.subr.msk.bf16.mxu0 %vm396_vm0, %v394_v31  ;;  %v356_v31 = vld [vmem:[%s2025_s3 + $0x40] sm:$0xff] }
  0x46   : > { %1302 = vmatpush3.bf16.xpose.msra.mxu0 %v440_v34 }
  0x47   : > { %1360 = vmatprep.subr.msk.bf16.mxu0 %vm396_vm0, %v395_v35  ;;  %v357_v35 = vld [vmem:[%s2025_s3 + $0x48] sm:$0xff] }
  0x4e   : > { %1304 = vmatpush3.bf16.xpose.msra.mxu0 %v443_v38  ;;  %v358_v38 = vld [vmem:[%s2025_s3 + $0x50] sm:$0xff] }
  0x55   : > { %1306 = vmatmul.mubr.msk.bf16.vlgmr.msra.gmra.mrb[0].mxu0 %vm396_vm0, %v381_v45 }
  0x56   : > { %1309 = vmatprep.mubr.msk.bf16.mxu0 %vm396_vm0, %v382_v46 }
  0x5d   : > { %1310 = vmatmul.mubr.msk.bf16.gmra.mrb[4].mxu0 %vm396_vm0, %v383_v55 }
  0x5e   : > { %1313 = vmatprep.mubr.msk.bf16.mxu0 %vm396_vm0, %v384_v56  ;;  %v332_v56 = vld [vmem:[%s1690_s14] sm:$0xff] }
  0x5f   : > { %v957_v59 = vpack.c.bf16 %v333_v57, %v332_v56 }
  0x61   : > { %1321 = vmatprep.subr.bf16.mxu1 %v957_v59 }
  0x62   : > { %1322 = vmatpush3.bf16.msra.mxu1 %v957_v59 }
  0x63   : > { %1323 = vmatprep.subr.bf16.mxu1 %v958_v61 }
  0x65   : > { %1314 = vmatmul.mubr.msk.bf16.gmra.mrb[8].mxu0 %vm396_vm0, %v385_v1 }
  0x66   : > { %1317 = vmatprep.mubr.msk.bf16.mxu0 %vm396_vm0, %v386_v2  ;;  %1324 = vmatpush3.bf16.msra.mxu1 %v958_v61 }
  0x6d   : > { %1318 = vmatmul.mubr.msk.bf16.gmra.mrb[12].mxu0 %vm396_vm0, %v387_v7 }
 0x128   : > { %v1307_v10 = vpop.f32.mrb[0].mxu0 }
 0x129   : > { %v1596_v11 = vadd.f32 %v1307_v10, %v350_v8  ;;  %v479_v12 = vpop.f32.mrb[1].mxu0 }
 0x12a   : > { %v1598_v13 = vadd.f32 %v479_v12, %v348_v9  ;;  %v1308_v15 = vpop.f32.mrb[2].mxu0 }
 0x12b   : > { %546 = vmax.xlane.f32.xlu1 %v1596_v11  ;;  %v482_v16 = vpop.f32.mrb[3].mxu0  ;;  %v1608_v18 = vadd.f32 %v1308_v15, %v351_v14 }
 0x12c   : > { %542 = vmax.xlane.f32.xlu0 %v1598_v13  ;;  %v1610_v19 = vadd.f32 %v482_v16, %v349_v17 }
 0x12f   : > { %548 = vmax.xlane.f32.xlu1 %v1608_v18 }
 0x130   : > { %v1311_v21 = vpop.f32.mrb[4].mxu0  ;;  %544 = vmax.xlane.f32.xlu0 %v1610_v19 }
 0x131   : > { %v495_v22 = vpop.f32.mrb[5].mxu0  ;;  %v1631_v30 = vadd.f32 %v1311_v21, %v354_v26 }
 0x132   : > { %v1620_v24 = vadd.f32 %v495_v22, %v352_v20  ;;  %v1312_v25 = vpop.f32.mrb[6].mxu0 }
 0x133   : > { %v498_v27 = vpop.f32.mrb[7].mxu0  ;;  %v1637_v32 = vadd.f32 %v1312_v25, %v355_v29 }
 0x134   : > { %v1625_v28 = vadd.f32 %v498_v27, %v353_v23  ;;  %550 = vmax.xlane.f32.xlu0 %v1620_v24 }
 0x136   : > { %552 = vmax.xlane.f32.xlu1 %v1625_v28 }
 0x138   : > { %v1315_v33 = vpop.f32.mrb[8].mxu0  ;;  %554 = vmax.xlane.f32.xlu0 %v1631_v30 }
 0x139   : > { %v511_v34 = vpop.f32.mrb[9].mxu0  ;;  %v1655_v42 = vadd.f32 %v1315_v33, %v358_v38 }
 0x13a   : > { %v1643_v36 = vadd.f32 %v511_v34, %v356_v31  ;;  %v1316_v37 = vpop.f32.mrb[10].mxu0  ;;  %556 = vmax.xlane.f32.xlu1 %v1637_v32 }
 0x13b   : > { %v514_v39 = vpop.f32.mrb[11].mxu0  ;;  %v1661_v44 = vadd.f32 %v1316_v37, %v359_v41 }
 0x13c   : > { %v1649_v40 = vadd.f32 %v514_v39, %v357_v35  ;;  %558 = vmax.xlane.f32.xlu0 %v1643_v36 }
 0x13e   : > { %560 = vmax.xlane.f32.xlu1 %v1649_v40 }
 0x140   : > { %v1319_v45 = vpop.f32.mrb[12].mxu0  ;;  %562 = vmax.xlane.f32.xlu0 %v1655_v42 }
 0x141   : > { %v527_v46 = vpop.f32.mrb[13].mxu0  ;;  %v1679_v54 = vadd.f32 %v1319_v45, %v362_v50 }
 0x142   : > { %v1667_v48 = vadd.f32 %v527_v46, %v360_v43  ;;  %v1320_v49 = vpop.f32.mrb[14].mxu0  ;;  %564 = vmax.xlane.f32.xlu1 %v1661_v44 }
 0x143   : > { %v530_v51 = vpop.f32.mrb[15].mxu0  ;;  %v1682_v55 = vadd.f32 %v1320_v49, %v363_v53  ;;  %v337_v49 = vld [vmem:[%s1690_s14 + $0x28] sm:$0xff] }
 0x144   : > { %v1673_v52 = vadd.f32 %v530_v51, %v361_v47  ;;  %566 = vmax.xlane.f32.xlu0 %v1667_v48  ;;  %v336_v47 = vld [vmem:[%s1690_s14 + $0x20] sm:$0xff] }
 0x145   : > { %v959_v51 = vpack.c.bf16 %v337_v49, %v336_v47 }
 0x146   : > { %568 = vmax.xlane.f32.xlu1 %v1673_v52 }
 0x147   : > { %1325 = vmatprep.subr.bf16.mxu1 %v959_v51 }
 0x148   : > { %570 = vmax.xlane.f32.xlu0 %v1679_v54  ;;  %1326 = vmatpush3.bf16.msra.mxu1 %v959_v51 }
 0x14a   : > { %572 = vmax.xlane.f32.xlu1 %v1682_v55 }
 0x1b8   : > { %v547_v62 = vpop.xlane.xlu1 %546 }
 0x1b9   : > { %v576_v63 = vsub.f32 %v1596_v11, %v547_v62  ;;  %v543_v0 = vpop.xlane.xlu0 %542 }
 0x1ba   : > { %v574_v1 = vsub.f32 %v1598_v13, %v543_v0  ;;  %v341_v0 = vld [vmem:[%s1690_s14 + $0x48] sm:$0xff] }
 0x1bb   : > { %v594_v4 = vmul.f32 1.442695, %v576_v63 }
 0x1bc   : > { %v590_v2 = vmul.f32 1.442695, %v574_v1  ;;  %v549_v3 = vpop.xlane.xlu1 %548 }
 0x1bd   : > { %v577_v5 = vsub.f32 %v1608_v18, %v549_v3  ;;  %v545_v6 = vpop.xlane.xlu0 %544 }
 0x1be   : > { %1385 = vpow2.f32 %v590_v2  ;;  %v575_v7 = vsub.f32 %v1610_v19, %v545_v6 }
 0x1bf   : > { %1387 = vpow2.f32 %v594_v4  ;;  %v596_v9 = vmul.f32 1.442695, %v577_v5  ;;  %v342_v4 = vld [vmem:[%s1690_s14 + $0x50] sm:$0xff]  ;;  %v343_v5 = vld [vmem:[%s1690_s14 + $0x58] sm:$0xff] }
 0x1c0   : > { %v592_v8 = vmul.f32 1.442695, %v575_v7  ;;  %v962_v7 = vpack.c.bf16 %v343_v5, %v342_v4 }
 0x1c1   : > { %v551_v10 = vpop.xlane.xlu0 %550 }
 0x1c2   : > { %1389 = vpow2.f32 %v592_v8  ;;  %v578_v12 = vsub.f32 %v1620_v24, %v551_v10  ;;  %v345_v10 = vld [vmem:[%s1690_s14 + $0x68] sm:$0xff] }
 0x1c3   : > { %v553_v11 = vpop.xlane.xlu1 %552  ;;  %1391 = vpow2.f32 %v596_v9  ;;  %v344_v9 = vld [vmem:[%s1690_s14 + $0x60] sm:$0xff] }
 0x1c4   : > { %v598_v14 = vmul.f32 1.442695, %v578_v12  ;;  %v579_v13 = vsub.f32 %v1625_v28, %v553_v11  ;;  %v963_v12 = vpack.c.bf16 %v345_v10, %v344_v9 }
 0x1c5   : > { %v555_v15 = vpop.xlane.xlu0 %554 }
 0x1c6   : > { %1393 = vpow2.f32 %v598_v14  ;;  %v600_v16 = vmul.f32 1.442695, %v579_v13  ;;  %v580_v17 = vsub.f32 %v1631_v30, %v555_v15  ;;  %v346_v14 = vld [vmem:[%s1690_s14 + $0x70] sm:$0xff]  ;;  %v347_v13 = vld [vmem:[%s1690_s14 + $0x78] sm:$0xff] }
 0x1c7   : > { %v557_v18 = vpop.xlane.xlu1 %556  ;;  %v964_v15 = vpack.c.bf16 %v347_v13, %v346_v14 }
 0x1c8   : > { %v1703_v20 = vpop.eup %1385  ;;  %v602_v19 = vmul.f32 1.442695, %v580_v17  ;;  %v581_v21 = vsub.f32 %v1637_v32, %v557_v18  ;;  %1395 = vpow2.f32 %v600_v16  ;;  %v686_v16 = vlaneseq }
 0x1c9   : > { %622 = vadd.xlane.f32.xlu0 %v1703_v20  ;;  %v559_v22 = vpop.xlane.xlu0 %558  ;;  %v1708_v25 = vpop.eup %1387 }
 0x1ca   : > { %1397 = vpow2.f32 %v602_v19  ;;  %v604_v23 = vmul.f32 1.442695, %v581_v21  ;;  %v582_v24 = vsub.f32 %v1643_v36, %v559_v22  ;;  %v1772_v17 = vshrl.u32 %v686_v16, 7 }
 0x1cb   : > { %v561_v26 = vpop.xlane.xlu1 %560  ;;  %v1777_v21 = vstv %s707_s21 }
 0x1cc   : > { %v1710_v27 = vpop.eup %1389  ;;  %v606_v28 = vmul.f32 1.442695, %v582_v24  ;;  %v583_v29 = vsub.f32 %v1649_v40, %v561_v26  ;;  %1399 = vpow2.f32 %v604_v23  ;;  %v688_v18 = vadd.s32 8, %v1772_v17 }
 0x1cd   : > { %626 = vadd.xlane.f32.xlu0 %v1708_v25  ;;  %624 = vadd.xlane.f32.xlu1 %v1710_v27  ;;  %v563_v30 = vpop.xlane.xlu0 %562  ;;  %v1716_v33 = vpop.eup %1391  ;;  %v708_v19 = vmul.u32 128, %v1772_v17  ;;  %v1779_v23 = vand.u32 127, %v686_v16  ;;  %v689_v26 = vadd.s32 16, %v1772_v17  ;;  %v695_v5 = vadd.s32 64, %v1772_v17 }
 0x1ce   : > { %1401 = vpow2.f32 %v606_v28  ;;  %v608_v31 = vmul.f32 1.442695, %v583_v29  ;;  %v584_v32 = vsub.f32 %v1655_v42, %v563_v30  ;;  %v709_v22 = vmul.u32 128, %v688_v18 }
 0x1cf   : > { %v565_v34 = vpop.xlane.xlu1 %564  ;;  %v725_v24 = vadd.s32 %v1777_v21, %v708_v19  ;;  %v690_v30 = vadd.s32 24, %v1772_v17  ;;  %v716_v19 = vmul.u32 128, %v695_v5 }
 0x1d0   : > { %v1718_v35 = vpop.eup %1393  ;;  %v610_v36 = vmul.f32 1.442695, %v584_v32  ;;  %v585_v37 = vsub.f32 %v1661_v44, %v565_v34  ;;  %1403 = vpow2.f32 %v608_v31  ;;  %v726_v28 = vadd.s32 %v1777_v21, %v709_v22 }
 0x1d1   : > { %628 = vadd.xlane.f32.xlu1 %v1716_v33  ;;  %630 = vadd.xlane.f32.xlu0 %v1718_v35  ;;  %v567_v38 = vpop.xlane.xlu0 %566  ;;  %v741_v29 = vadd.s32 %v725_v24, %v1779_v23  ;;  %v710_v31 = vmul.u32 128, %v689_v26  ;;  %v691_v32 = vadd.s32 32, %v1772_v17  ;;  %v692_v34 = vadd.s32 40, %v1772_v17 }
 0x1d2   : > { %1405 = vpow2.f32 %v610_v36  ;;  %v612_v39 = vmul.f32 1.442695, %v585_v37  ;;  %v586_v40 = vsub.f32 %v1667_v48, %v567_v38  ;;  %v1724_v41 = vpop.eup %1395  ;;  %v742_v36 = vadd.s32 %v726_v28, %v1779_v23 }
 0x1d3   : > { %v569_v42 = vpop.xlane.xlu1 %568  ;;  %v757_v37 = vshrl.u32 %v741_v29, 16  ;;  %v711_v38 = vmul.u32 128, %v690_v30  ;;  %v697_v30 = vadd.s32 80, %v1772_v17 }
 0x1d4   : > { %v1726_v43 = vpop.eup %1397  ;;  %v614_v45 = vmul.f32 1.442695, %v586_v40  ;;  %v587_v44 = vsub.f32 %v1673_v52, %v569_v42  ;;  %1407 = vpow2.f32 %v612_v39  ;;  %v727_v39 = vadd.s32 %v1777_v21, %v710_v31 }
 0x1d5   : > { %632 = vadd.xlane.f32.xlu1 %v1724_v41  ;;  %634 = vadd.xlane.f32.xlu0 %v1726_v43  ;;  %v571_v46 = vpop.xlane.xlu0 %570  ;;  %v693_v40 = vadd.s32 48, %v1772_v17  ;;  %v712_v42 = vmul.u32 128, %v691_v32  ;;  %v773_v47 = vxor.u32 %v757_v37, %v741_v29  ;;  %v728_v49 = vadd.s32 %v1777_v21, %v711_v38 }
 0x1d6   : > { %1409 = vpow2.f32 %v614_v45  ;;  %v616_v50 = vmul.f32 1.442695, %v587_v44  ;;  %v588_v48 = vsub.f32 %v1679_v54, %v571_v46  ;;  %v1734_v53 = vpop.eup %1399  ;;  %v338_v54 = vld [vmem:[%s1690_s14 + $0x30] sm:$0xff]  ;;  %v713_v45 = vmul.u32 128, %v692_v34 }
 0x1d7   : > { %v573_v56 = vpop.xlane.xlu1 %572  ;;  %v960_v62 = vpack.c.bf16 %v339_v60, %v338_v54  ;;  %v758_v44 = vshrl.u32 %v742_v36, 16  ;;  %v694_v46 = vadd.s32 56, %v1772_v17  ;;  %v729_v51 = vadd.s32 %v1777_v21, %v712_v42 }
 0x1d8   : > { %v1736_v57 = vpop.eup %1401  ;;  %v618_v52 = vmul.f32 1.442695, %v588_v48  ;;  %v589_v58 = vsub.f32 %v1682_v55, %v573_v56  ;;  %1411 = vpow2.f32 %v616_v50  ;;  %v340_v55 = vld [vmem:[%s1690_s14 + $0x40] sm:$0xff]  ;;  %v743_v50 = vadd.s32 %v727_v39, %v1779_v23 }
 0x1d9   : > { %636 = vadd.xlane.f32.xlu1 %v1734_v53  ;;  %638 = vadd.xlane.f32.xlu0 %v1736_v57  ;;  %v961_v2 = vpack.c.bf16 %v341_v0, %v340_v55  ;;  %v714_v48 = vmul.u32 128, %v693_v40  ;;  %v730_v56 = vadd.s32 %v1777_v21, %v713_v45  ;;  %v744_v54 = vadd.s32 %v728_v49, %v1779_v23 }
 0x1da   : > { %1413 = vpow2.f32 %v618_v52  ;;  %v620_v59 = vmul.f32 1.442695, %v589_v58  ;;  %v1743_v61 = vpop.eup %1403  ;;  %1327 = vmatprep.subr.bf16.mxu1 %v960_v62  ;;  %v774_v52 = vxor.u32 %v758_v44, %v742_v36  ;;  %v715_v58 = vmul.u32 128, %v694_v46 }
 0x1db   : > { %1328 = vmatpush3.bf16.msra.mxu1 %v960_v62  ;;  %v759_v60 = vshrl.u32 %v743_v50, 16  ;;  %v731_v62 = vadd.s32 %v1777_v21, %v714_v48  ;;  %v745_v55 = vadd.s32 %v729_v51, %v1779_v23  ;;  %v746_v0 = vadd.s32 %v730_v56, %v1779_v23 }
 0x1dc   : > { %v1745_v63 = vpop.eup %1405  ;;  %1415 = vpow2.f32 %v620_v59  ;;  %1329 = vmatprep.subr.bf16.mxu1 %v961_v2  ;;  %v789_v59 = vmul.u32 2146121005, %v773_v47  ;;  %v732_v4 = vadd.s32 %v1777_v21, %v715_v58  ;;  %v760_v10 = vshrl.u32 %v744_v54, 16 }
 0x1dd   : > { %640 = vadd.xlane.f32.xlu1 %v1743_v61  ;;  %642 = vadd.xlane.f32.xlu0 %v1745_v63  ;;  %v747_v14 = vadd.s32 %v731_v62, %v1779_v23  ;;  %v761_v13 = vshrl.u32 %v745_v55, 16  ;;  %v698_v31 = vadd.s32 88, %v1772_v17  ;;  %v733_v38 = vadd.s32 %v1777_v21, %v716_v19 }
 0x1de   : > { %v1751_v1 = vpop.eup %1407  ;;  %v805_v9 = vshrl.u32 %v789_v59, 15  ;;  %v748_v18 = vadd.s32 %v732_v4, %v1779_v23  ;;  %v776_v26 = vxor.u32 %v760_v10, %v744_v54  ;;  %v718_v46 = vmul.u32 128, %v697_v30 }
 0x1df   : > { %1330 = vmatpush3.bf16.msra.mxu1 %v961_v2  ;;  %v790_v2 = vmul.u32 2146121005, %v774_v52  ;;  %v763_v29 = vshrl.u32 %v747_v14, 16  ;;  %v777_v32 = vxor.u32 %v761_v13, %v745_v55  ;;  %v719_v47 = vmul.u32 128, %v698_v31 }
 0x1e0   : > { %v1753_v3 = vpop.eup %1409  ;;  %1331 = vmatprep.subr.bf16.mxu1 %v962_v7  ;;  %v821_v24 = vxor.u32 %v805_v9, %v789_v59  ;;  %v764_v37 = vshrl.u32 %v748_v18, 16  ;;  %v792_v42 = vmul.u32 2146121005, %v776_v26  ;;  %v699_v49 = vadd.s32 96, %v1772_v17 }
 0x1e1   : > { %644 = vadd.xlane.f32.xlu1 %v1751_v1  ;;  %646 = vadd.xlane.f32.xlu0 %v1753_v3  ;;  %v806_v16 = vshrl.u32 %v790_v2, 15  ;;  %v779_v44 = vxor.u32 %v763_v29, %v747_v14  ;;  %v793_v48 = vmul.u32 2146121005, %v777_v32  ;;  %v749_v58 = vadd.s32 %v733_v38, %v1779_v23 }
 0x1e2   : > { %v1759_v6 = vpop.eup %1411  ;;  %v837_v40 = vmul.u32 2221713035, %v821_v24  ;;  %v780_v52 = vxor.u32 %v764_v37, %v748_v18  ;;  %v720_v4 = vmul.u32 128, %v699_v49  ;;  %v701_v10 = vadd.s32 112, %v1772_v17 }
 0x1e3   : > { %1332 = vmatpush3.bf16.msra.mxu1 %v962_v7  ;;  %v696_v7 = vadd.s32 72, %v1772_v17  ;;  %v822_v36 = vxor.u32 %v806_v16, %v790_v2  ;;  %v795_v55 = vmul.u32 2146121005, %v779_v44  ;;  %v736_v2 = vadd.s32 %v1777_v21, %v719_v47 }
 0x1e4   : > { %v1761_v8 = vpop.eup %1413  ;;  %1333 = vmatprep.subr.bf16.mxu1 %v963_v12  ;;  %v853_v54 = vshrl.u32 %v837_v40, 16  ;;  %v796_v13 = vmul.u32 2146121005, %v780_v52  ;;  %v737_v29 = vadd.s32 %v1777_v21, %v720_v4 }
 0x1e5   : > { %648 = vadd.xlane.f32.xlu1 %v1759_v6  ;;  %650 = vadd.xlane.f32.xlu0 %v1761_v8  ;;  %v717_v22 = vmul.u32 128, %v696_v7  ;;  %v838_v56 = vmul.u32 2221713035, %v822_v36  ;;  %v809_v7 = vshrl.u32 %v793_v48, 15  ;;  %v811_v24 = vshrl.u32 %v795_v55, 15 }
 0x1e6   : > { %v1767_v11 = vpop.eup %1415  ;;  %v869_v18 = vxor.u32 %v853_v54, %v837_v40  ;;  %v812_v37 = vshrl.u32 %v796_v13, 15  ;;  %v753_v49 = vadd.s32 %v737_v29, %v1779_v23 }
 0x1e7   : > { %1334 = vmatpush3.bf16.msra.mxu1 %v963_v12  ;;  %v775_v12 = vxor.u32 %v759_v60, %v743_v50  ;;  %v734_v39 = vadd.s32 %v1777_v21, %v717_v22  ;;  %v700_v50 = vadd.s32 104, %v1772_v17  ;;  %v808_v60 = vshrl.u32 %v792_v42, 15 }
 0x1e8   : > { %1335 = vmatprep.subr.bf16.mxu1 %v964_v15  ;;  %v854_v14 = vshrl.u32 %v838_v56, 16  ;;  %v825_v31 = vxor.u32 %v809_v7, %v793_v48  ;;  %v885_v40 = vshrl.u32 %v869_v18, 9  ;;  %v827_v44 = vxor.u32 %v811_v24, %v795_v55 }
 0x1e9   : > { %652 = vadd.xlane.f32.xlu1 %v1767_v11  ;;  %v791_v28 = vmul.u32 2146121005, %v775_v12  ;;  %v750_v59 = vadd.s32 %v734_v39, %v1779_v23  ;;  %v721_v5 = vmul.u32 128, %v700_v50  ;;  %v702_v12 = vadd.s32 120, %v1772_v17 }
 0x1ea   : > { %v824_v19 = vxor.u32 %v808_v60, %v792_v42  ;;  %v870_v36 = vxor.u32 %v854_v14, %v838_v56  ;;  %v841_v54 = vmul.u32 2221713035, %v825_v31  ;;  %v769_v7 = vshrl.u32 %v753_v49, 16 }
 0x1eb   : > { %1336 = vmatpush3.bf16.msra.mxu1 %v964_v15  ;;  %v762_v15 = vshrl.u32 %v746_v0, 16  ;;  %v807_v45 = vshrl.u32 %v791_v28, 15  ;;  %v766_v16 = vshrl.u32 %v750_v59, 16  ;;  %v738_v30 = vadd.s32 %v1777_v21, %v721_v5 }
 0x1ec   : > { %v723_v17 = vmul.u32 128, %v702_v12  ;;  %v840_v42 = vmul.u32 2221713035, %v824_v19  ;;  %v857_v14 = vshrl.u32 %v841_v54, 16  ;;  %vm1831_vm1 = vcmp.ge.u32.totalorder %v885_v40, 838860 }
 0x1ed   : > { %v778_v34 = vxor.u32 %v762_v15, %v746_v0  ;;  %v823_v62 = vxor.u32 %v807_v45, %v791_v28  ;;  %v735_v0 = vadd.s32 %v1777_v21, %v718_v46  ;;  %v765_v15 = vshrl.u32 %v749_v58, 16 }
 0x1ee   : > { %v752_v28 = vadd.s32 %v736_v2, %v1779_v23  ;;  %v782_v39 = vxor.u32 %v766_v16, %v750_v59  ;;  %v754_v50 = vadd.s32 %v738_v30, %v1779_v23  ;;  %v740_v56 = vadd.s32 %v1777_v21, %v723_v17 }
 0x1ef   : > { %v794_v51 = vmul.u32 2146121005, %v778_v34  ;;  %v839_v22 = vmul.u32 2221713035, %v823_v62  ;;  %v751_v26 = vadd.s32 %v735_v0, %v1779_v23  ;;  %v781_v38 = vxor.u32 %v765_v15, %v749_v58 }
 0x1f0   : > { %v722_v34 = vmul.u32 128, %v701_v10  ;;  %v768_v47 = vshrl.u32 %v752_v28, 16  ;;  %v828_v58 = vxor.u32 %v812_v37, %v796_v13  ;;  %v798_v60 = vmul.u32 2146121005, %v782_v39 }
 0x1f1   : > { %v810_v9 = vshrl.u32 %v794_v51, 15  ;;  %v855_v45 = vshrl.u32 %v839_v22, 16  ;;  %v767_v46 = vshrl.u32 %v751_v26, 16  ;;  %v797_v59 = vmul.u32 2146121005, %v781_v38 }
 0x1f2   : > { %v886_v62 = vshrl.u32 %v870_v36, 9  ;;  %v856_v0 = vshrl.u32 %v840_v42, 16  ;;  %v843_v2 = vmul.u32 2221713035, %v827_v44  ;;  %v784_v5 = vxor.u32 %v768_v47, %v752_v28 }
 0x1f3   : > { %v826_v32 = vxor.u32 %v810_v9, %v794_v51  ;;  %v739_v51 = vadd.s32 %v1777_v21, %v722_v34  ;;  %v871_v55 = vxor.u32 %v855_v45, %v839_v22  ;;  %v783_v4 = vxor.u32 %v767_v46, %v751_v26 }
 0x1f4   : > { %v770_v9 = vshrl.u32 %v754_v50, 16  ;;  %v756_v21 = vadd.s32 %v740_v56, %v1779_v23  ;;  %v844_v13 = vmul.u32 2221713035, %v828_v58  ;;  %v813_v18 = vshrl.u32 %v797_v59, 15 }
 0x1f5   : > { %v842_v48 = vmul.u32 2221713035, %v826_v32  ;;  %v755_v16 = vadd.s32 %v739_v51, %v1779_v23  ;;  %v814_v19 = vshrl.u32 %v798_v60, 15  ;;  %v872_v24 = vxor.u32 %v856_v0, %v840_v42 }
 0x1f6   : > { %v887_v22 = vshrl.u32 %v871_v55, 9  ;;  %v859_v29 = vshrl.u32 %v843_v2, 16  ;;  %v799_v26 = vmul.u32 2146121005, %v783_v4  ;;  %v800_v28 = vmul.u32 2146121005, %v784_v5 }
 0x1f7   : > { %v858_v15 = vshrl.u32 %v842_v48, 16  ;;  %v1827_v30 = vxor.u32 %v769_v7, %v753_v49  ;;  %v1829_v31 = vxor.u32 %v770_v9, %v754_v50  ;;  %v873_v23 = vxor.u32 %v857_v14, %v841_v54 }
 0x1f8   : > { %v771_v37 = vshrl.u32 %v755_v16, 16  ;;  %v772_v38 = vshrl.u32 %v756_v21, 16  ;;  %v860_v39 = vshrl.u32 %v844_v13, 16  ;;  %v1835_v42 = vxor.u32 %v813_v18, %v797_v59 }
 0x1f9   : > { %v874_v36 = vxor.u32 %v858_v15, %v842_v48  ;;  %v1837_v45 = vxor.u32 %v814_v19, %v798_v60  ;;  %vm1839_vm2 = vcmp.ge.u32.totalorder %v886_v62, 838860  ;;  %v888_v46 = vshrl.u32 %v872_v24, 9 }
 0x1fa   : > { %v875_v40 = vxor.u32 %v859_v29, %v843_v2  ;;  %v815_v49 = vshrl.u32 %v799_v26, 15  ;;  %v816_v50 = vshrl.u32 %v800_v28, 15  ;;  %v802_v54 = vmul.u32 2146121005, %v1829_v31  ;;  %vm1227_vm7 = vmpackc.low %vm1839_vm2, %vm1831_vm1 }
 0x1fb   : > { %vm1845_vm3 = vcmp.ge.u32.totalorder %v887_v22, 838860  ;;  %v889_v58 = vshrl.u32 %v873_v23, 9  ;;  %v890_v59 = vshrl.u32 %v874_v36, 9  ;;  %v1849_v60 = vxor.u32 %v771_v37, %v755_v16 }
 0x1fc   : > { %v1851_v62 = vxor.u32 %v772_v38, %v756_v21  ;;  %v1853_v0 = vxor.u32 %v860_v39, %v844_v13  ;;  %v845_v55 = vmul.u32 2221713035, %v1835_v42  ;;  %v846_v2 = vmul.u32 2221713035, %v1837_v45 }
 0x1fd   : > { %vm1857_vm4 = vcmp.ge.u32.totalorder %v888_v46, 838860  ;;  %v891_v7 = vshrl.u32 %v875_v40, 9  ;;  %v818_v15 = vshrl.u32 %v802_v54, 15  ;;  %vm1865_vm5 = vcmp.ge.u32.totalorder %v889_v58, 838860 }
 0x1fe   : > { %vm1869_vm6 = vcmp.ge.u32.totalorder %v890_v59, 838860  ;;  %v803_v22 = vmul.u32 2146121005, %v1849_v60  ;;  %v804_v29 = vmul.u32 2146121005, %v1851_v62  ;;  %vm1230_vm9 = vmpackc.low %vm1857_vm4, %vm1845_vm3 }
 0x1ff   : > { %v1886_v39 = vxor.u32 %v818_v15, %v802_v54  ;;  %vm1888_vm8 = vcmp.ge.u32.totalorder %v891_v7, 838860  ;;  %vm1233_vm11 = vmpackc.low %vm1869_vm6, %vm1865_vm5 }
 0x256   : > { %v623_v52 = vpop.xlane.xlu0 %622 }
 0x257   : > { %1417 = vrcp.f32 %v623_v52  ;;  %v801_v52 = vmul.u32 2146121005, %v1827_v30  ;;  %v862_v30 = vshrl.u32 %v846_v2, 16 }
 0x259   : > { %v817_v14 = vshrl.u32 %v801_v52, 15 }
 0x25a   : > { %v625_v10 = vpop.xlane.xlu1 %624  ;;  %v627_v12 = vpop.xlane.xlu0 %626 }
 0x25b   : > { %1419 = vrcp.f32 %v625_v10  ;;  %v1861_v10 = vxor.u32 %v815_v49, %v799_v26  ;;  %v892_v26 = vshrl.u32 %v1853_v0, 9  ;;  %v1884_v38 = vxor.u32 %v817_v14, %v801_v52 }
 0x25c   : > { %1421 = vrcp.f32 %v627_v12  ;;  %v1863_v12 = vxor.u32 %v816_v50, %v800_v28  ;;  %v861_v28 = vshrl.u32 %v845_v55, 16 }
 0x25d   : > { %v847_v36 = vmul.u32 2221713035, %v1861_v10  ;;  %vm1905_vm10 = vcmp.ge.u32.totalorder %v892_v26, 838860 }
 0x25e   : > { %v629_v32 = vpop.xlane.xlu1 %628  ;;  %v631_v34 = vpop.xlane.xlu0 %630  ;;  %v848_v37 = vmul.u32 2221713035, %v1863_v12  ;;  %v877_v50 = vxor.u32 %v861_v28, %v845_v55  ;;  %vm1236_vm14 = vmpackc.low %vm1905_vm10, %vm1888_vm8 }
 0x25f   : > { %1423 = vrcp.f32 %v629_v32  ;;  %v863_v59 = vshrl.u32 %v847_v36, 16 }
 0x260   : > { %1425 = vrcp.f32 %v631_v34  ;;  %v864_v60 = vshrl.u32 %v848_v37, 16 }
 0x261   : > { %v1418_v47 = vpop.eup %1417 }
 0x262   : > { %v633_v48 = vpop.xlane.xlu1 %632  ;;  %v635_v51 = vpop.xlane.xlu0 %634  ;;  %v655_v4 = vmul.f32 1.1111112, %v1418_v47  ;;  %v820_v47 = vshrl.u32 %v804_v29, 15 }
 0x263   : > { %1427 = vrcp.f32 %v633_v48  ;;  %v878_v48 = vxor.u32 %v862_v30, %v846_v2 }
 0x264   : > { %1429 = vrcp.f32 %v635_v51  ;;  %v917_v32 = vmul.f32 %v1703_v20, %v655_v4  ;;  %v836_v4 = vxor.u32 %v820_v47, %v804_v29 }
 0x265   : > { %v1420_v9 = vpop.eup %1419  ;;  %v894_v10 = vshrl.u32 %v878_v48, 9 }
 0x266   : > { %v1422_v16 = vpop.eup %1421  ;;  %v657_v21 = vmul.f32 1.1111112, %v1420_v9  ;;  %v637_v13 = vpop.xlane.xlu1 %636  ;;  %v893_v9 = vshrl.u32 %v877_v50, 9  ;;  %v852_v30 = vmul.u32 2221713035, %v836_v4 }
 0x267   : > { %v639_v18 = vpop.xlane.xlu0 %638  ;;  %1431 = vrcp.f32 %v637_v13  ;;  %v659_v31 = vmul.f32 1.1111112, %v1422_v16  ;;  %v880_v13 = vxor.u32 %v864_v60, %v848_v37  ;;  %vm1924_vm13 = vcmp.ge.u32.totalorder %v894_v10, 838860 }
 0x268   : > { %1433 = vrcp.f32 %v639_v18  ;;  %v918_v34 = vmul.f32 %v1710_v27, %v657_v21  ;;  %v819_v27 = vshrl.u32 %v803_v22, 15  ;;  %v879_v21 = vxor.u32 %v863_v59, %v847_v36 }
 0x269   : > { %v1424_v23 = vpop.eup %1423  ;;  %v919_v51 = vmul.f32 %v1708_v25, %v659_v31  ;;  %v849_v25 = vmul.u32 2221713035, %v1884_v38  ;;  %vm1920_vm12 = vcmp.ge.u32.totalorder %v893_v9, 838860  ;;  %v896_v38 = vshrl.u32 %v880_v13, 9 }
 0x26a   : > { %v1426_v42 = vpop.eup %1425  ;;  %v661_v45 = vmul.f32 1.1111112, %v1424_v23  ;;  %v641_v46 = vpop.xlane.xlu1 %640  ;;  %v1228_v40 = vpack.c.bf16 %v918_v34, %v917_v32  ;;  %v835_v17 = vxor.u32 %v819_v27, %v803_v22  ;;  %v895_v37 = vshrl.u32 %v879_v21, 9  ;;  %vm1239_vm15 = vmpackc.low %vm1924_vm13, %vm1920_vm12 }
 0x26b   : > { %v643_v20 = vpop.xlane.xlu0 %642  ;;  %1435 = vrcp.f32 %v641_v46  ;;  %v663_v54 = vmul.f32 1.1111112, %v1426_v42  ;;  %v865_v18 = vshrl.u32 %v849_v25, 16  ;;  %v868_v24 = vshrl.u32 %v852_v30, 16 }
 0x26c   : > { %v920_v52 = vmul.f32 %v1716_v33, %v661_v45  ;;  %1437 = vrcp.f32 %v643_v20  ;;  %1337 = vmatprep.mubr.msk.bf16.mxu1 %vm1227_vm7, %v1228_v40  ;;  %v850_v33 = vmul.u32 2221713035, %v1886_v39  ;;  %v851_v5 = vmul.u32 2221713035, %v835_v17 }
 0x26d   : > { %v1428_v58 = vpop.eup %1427  ;;  %v921_v12 = vmul.f32 %v1718_v35, %v663_v54  ;;  %v881_v39 = vxor.u32 %v865_v18, %v849_v25  ;;  %vm1945_vm1 = vcmp.ge.u32.totalorder %v895_v37, 838860  ;;  %vm1949_vm2 = vcmp.ge.u32.totalorder %v896_v38, 838860 }
 0x26e   : > { %v1430_v62 = vpop.eup %1429  ;;  %v1231_v0 = vpack.c.bf16 %v920_v52, %v919_v51  ;;  %v665_v55 = vmul.f32 1.1111112, %v1428_v58  ;;  %v645_v44 = vpop.xlane.xlu1 %644  ;;  %v866_v35 = vshrl.u32 %v850_v33, 16  ;;  %v867_v20 = vshrl.u32 %v851_v5, 16  ;;  %vm1242_vm3 = vmpackc.low %vm1949_vm2, %vm1945_vm1 }
 0x26f   : > { %v647_v2 = vpop.xlane.xlu0 %646  ;;  %1439 = vrcp.f32 %v645_v44  ;;  %v667_v15 = vmul.f32 1.1111112, %v1430_v62  ;;  %v897_v48 = vshrl.u32 %v881_v39, 9  ;;  %v884_v58 = vxor.u32 %v868_v24, %v852_v30 }
 0x270   : > { %v922_v14 = vmul.f32 %v1724_v41, %v665_v55  ;;  %1441 = vrcp.f32 %v647_v2  ;;  %1338 = vmatmul.mubr.msk.bf16.vlgmr.msra.gmra.mrb[0].mxu1 %vm1230_vm9, %v1231_v0  ;;  %v883_v54 = vxor.u32 %v867_v20, %v851_v5 }
 0x271   : > { %v1432_v16 = vpop.eup %1431  ;;  %v923_v32 = vmul.f32 %v1726_v43, %v667_v15  ;;  %v882_v43 = vxor.u32 %v866_v35, %v850_v33  ;;  %vm1959_vm4 = vcmp.ge.u32.totalorder %v897_v48, 838860  ;;  %v900_v2 = vshrl.u32 %v884_v58, 9 }
 0x272   : > { %v1434_v22 = vpop.eup %1433  ;;  %v1234_v41 = vpack.c.bf16 %v922_v14, %v921_v12  ;;  %v669_v29 = vmul.f32 1.1111112, %v1432_v16  ;;  %v649_v26 = vpop.xlane.xlu1 %648 }
 0x273   : > { %v651_v28 = vpop.xlane.xlu0 %650  ;;  %1443 = vrcp.f32 %v649_v26  ;;  %v671_v23 = vmul.f32 1.1111112, %v1434_v22  ;;  %vm916_vm8 = vcmp.ge.u32.totalorder %v900_v2, 838860 }
 0x274   : > { %v924_v34 = vmul.f32 %v1734_v53, %v669_v29  ;;  %1445 = vrcp.f32 %v651_v28  ;;  %1341 = vmatprep.mubr.msk.bf16.mxu1 %vm1233_vm11, %v1234_v41 }
 0x275   : > { %v1436_v36 = vpop.eup %1435  ;;  %v925_v19 = vmul.f32 %v1736_v57, %v671_v23  ;;  %v898_v57 = vshrl.u32 %v882_v43, 9 }
 0x276   : > { %v1438_v42 = vpop.eup %1437  ;;  %v1237_v53 = vpack.c.bf16 %v924_v34, %v923_v32  ;;  %v673_v45 = vmul.f32 1.1111112, %v1436_v36  ;;  %v653_v46 = vpop.xlane.xlu1 %652 }
 0x277   : > { %1447 = vrcp.f32 %v653_v46  ;;  %v675_v27 = vmul.f32 1.1111112, %v1438_v42  ;;  %vm1963_vm5 = vcmp.ge.u32.totalorder %v898_v57, 838860 }
 0x278   : > { %v926_v40 = vmul.f32 %v1743_v61, %v673_v45  ;;  %1342 = vmatmul.mubr.msk.bf16.gmra.mrb[4].mxu1 %vm1236_vm14, %v1237_v53  ;;  %vm1245_vm6 = vmpackc.low %vm1963_vm5, %vm1959_vm4 }
 0x279   : > { %v1440_v47 = vpop.eup %1439  ;;  %v927_v59 = vmul.f32 %v1745_v63, %v675_v27 }
 0x27a   : > { %v1442_v51 = vpop.eup %1441  ;;  %v1240_v61 = vpack.c.bf16 %v926_v40, %v925_v19  ;;  %v677_v52 = vmul.f32 1.1111112, %v1440_v47 }
 0x27b   : > { %v679_v25 = vmul.f32 1.1111112, %v1442_v51 }
 0x27c   : > { %v928_v60 = vmul.f32 %v1751_v1, %v677_v52  ;;  %1345 = vmatprep.mubr.msk.bf16.mxu1 %vm1239_vm15, %v1240_v61  ;;  %v899_v1 = vshrl.u32 %v883_v54, 9 }
 0x27d   : > { %v1444_v33 = vpop.eup %1443  ;;  %v929_v17 = vmul.f32 %v1753_v3, %v679_v25 }
 0x27e   : > { %v1446_v55 = vpop.eup %1445  ;;  %v1243_v63 = vpack.c.bf16 %v928_v60, %v927_v59  ;;  %v681_v44 = vmul.f32 1.1111112, %v1444_v33  ;;  %vm915_vm7 = vcmp.ge.u32.totalorder %v899_v1, 838860 }
 0x27f   : > { %v683_v7 = vmul.f32 1.1111112, %v1446_v55  ;;  %vm1248_vm9 = vmpackc.low %vm916_vm8, %vm915_vm7 }
 0x280   : > { %v930_v4 = vmul.f32 %v1759_v6, %v681_v44  ;;  %1346 = vmatmul.mubr.msk.bf16.gmra.mrb[8].mxu1 %vm1242_vm3, %v1243_v63 }
 0x281   : > { %v1448_v9 = vpop.eup %1447  ;;  %v931_v14 = vmul.f32 %v1761_v8, %v683_v7 }
 0x282   : > { %v1246_v10 = vpack.c.bf16 %v930_v4, %v929_v17  ;;  %v685_v12 = vmul.f32 1.1111112, %v1448_v9 }
 0x284   : > { %v932_v15 = vmul.f32 %v1767_v11, %v685_v12  ;;  %1349 = vmatprep.mubr.msk.bf16.mxu1 %vm1245_vm6, %v1246_v10 }
 0x286   : > { %v1249_v3 = vpack.c.bf16 %v932_v15, %v931_v14 }
 0x288   : > { %1350 = vmatmul.mubr.msk.bf16.gmra.mrb[12].mxu1 %vm1248_vm9, %v1249_v3 }
 0x343   : > { %v1339_v6 = vpop.f32.mrb[0].mxu1 }
 0x344   : > { %1064 = vst.msk [vmem:[%s1979_s23 + $0x10] sm:$0xff] %vm396_vm0, %v1339_v6  ;;  %v999_v8 = vpop.f32.mrb[1].mxu1 }
 0x345   : > { %1062 = vst.msk [vmem:[%s1979_s23] sm:$0xff] %vm396_vm0, %v999_v8  ;;  %v1340_v11 = vpop.f32.mrb[2].mxu1 }
 0x346   : > { %1065 = vst.msk [vmem:[%s1979_s23 + $0x18] sm:$0xff] %vm396_vm0, %v1340_v11  ;;  %v1002_v16 = vpop.f32.mrb[3].mxu1 }
 0x347   : > { %1063 = vst.msk [vmem:[%s1979_s23 + $0x8] sm:$0xff] %vm396_vm0, %v1002_v16 }
 0x34b   : > { %v1343_v21 = vpop.f32.mrb[4].mxu1 }
 0x34c   : > { %1068 = vst.msk [vmem:[%s1979_s23 + $0x30] sm:$0xff] %vm396_vm0, %v1343_v21  ;;  %v1015_v13 = vpop.f32.mrb[5].mxu1 }
 0x34d   : > { %1066 = vst.msk [vmem:[%s1979_s23 + $0x20] sm:$0xff] %vm396_vm0, %v1015_v13  ;;  %v1344_v18 = vpop.f32.mrb[6].mxu1 }
 0x34e   : > { %1069 = vst.msk [vmem:[%s1979_s23 + $0x38] sm:$0xff] %vm396_vm0, %v1344_v18  ;;  %v1018_v35 = vpop.f32.mrb[7].mxu1 }
 0x34f   : > { %1067 = vst.msk [vmem:[%s1979_s23 + $0x28] sm:$0xff] %vm396_vm0, %v1018_v35 }
 0x353   : > { %v1347_v22 = vpop.f32.mrb[8].mxu1 }
 0x354   : > { %1072 = vst.msk [vmem:[%s1979_s23 + $0x50] sm:$0xff] %vm396_vm0, %v1347_v22  ;;  %v1031_v41 = vpop.f32.mrb[9].mxu1 }
 0x355   : > { %1070 = vst.msk [vmem:[%s1979_s23 + $0x40] sm:$0xff] %vm396_vm0, %v1031_v41  ;;  %v1348_v29 = vpop.f32.mrb[10].mxu1 }
 0x356   : > { %1073 = vst.msk [vmem:[%s1979_s23 + $0x58] sm:$0xff] %vm396_vm0, %v1348_v29  ;;  %v1034_v26 = vpop.f32.mrb[11].mxu1 }
 0x357   : > { %1071 = vst.msk [vmem:[%s1979_s23 + $0x48] sm:$0xff] %vm396_vm0, %v1034_v26 }
 0x35b   : > { %v1351_v28 = vpop.f32.mrb[12].mxu1 }
 0x35c   : > { %1076 = vst.msk [vmem:[%s1979_s23 + $0x70] sm:$0xff] %vm396_vm0, %v1351_v28  ;;  %v1047_v5 = vpop.f32.mrb[13].mxu1 }
 0x35d   : > { %1074 = vst.msk [vmem:[%s1979_s23 + $0x60] sm:$0xff] %vm396_vm0, %v1047_v5  ;;  %v1352_v30 = vpop.f32.mrb[14].mxu1 }
 0x35e   : > { %1077 = vst.msk [vmem:[%s1979_s23 + $0x78] sm:$0xff] %vm396_vm0, %v1352_v30  ;;  %v1050_v56 = vpop.f32.mrb[15].mxu1 }
 0x35f   : > { %1075 = vst.msk [vmem:[%s1979_s23 + $0x68] sm:$0xff] %vm396_vm0, %v1050_v56 }
 0x360 PF: > { %s14_s17 = sadd.s32 1, %s1471_s17   ;;  %s2055_s15 = smov %s1467_s16 }
 0x361   : > { %p11_p5 = scmp.ge.s32.totalorder %s14_s17, 10   ;;  %s2056_s16 = smov %s2058_s18 }
 0x363   :  { %13 = sbr.rel (!%p11_p5) target bundleno = 2 (0x2), region = 75 }

</bundles_post_ra>
